<compile_context>
chip_gen: v5e
topology: v5e:2x2
jax: 0.10.0
libtpu: 0.0.40
codegen_flags: <defaults>
</compile_context>

<pallas_src>
import jax
import jax.numpy as jnp
from jax.experimental import pallas as pl
from jax.experimental.pallas import tpu as pltpu

INPUT_SIZE = 38
HIDDEN = 128
OUTPUT_SIZE = 32


def _round_up(n, m):
    return ((n + m - 1) // m) * m


def _mlp_kernel(x_ref, w1_ref, b1_ref, w2_ref, b2_ref, w3_ref, b3_ref, o_ref):
    # fc1 + ReLU (f32 MXU, f32 accumulate).  K=38 is ragged; the MXU handles it.
    x = x_ref[...]                                               # (TB, 38) f32
    h1 = jnp.dot(x, w1_ref[...], preferred_element_type=jnp.float32)
    h1 = jnp.maximum(h1 + b1_ref[...], 0.0)                      # (TB, 128) f32

    # fc2 + ReLU
    h2 = jnp.dot(h1, w2_ref[...], preferred_element_type=jnp.float32)
    h2 = jnp.maximum(h2 + b2_ref[...], 0.0)                      # (TB, 128) f32

    # Dropout(p=0.5): identity in eval/inference mode.
    # TODO(synk): training-mode stochastic dropout (pltpu.prng_random_bits mask)
    # intentionally omitted; forward matches model.eval() semantics.

    # fc3 -> (TB, 32) logits; log_softmax over the feature (lane) axis.
    logits = jnp.dot(h2, w3_ref[...], preferred_element_type=jnp.float32)
    logits = logits + b3_ref[...]                                # (TB, 32) f32

    m = jnp.max(logits, axis=-1, keepdims=True)
    shifted = logits - m
    lse = jnp.log(jnp.sum(jnp.exp(shifted), axis=-1, keepdims=True))
    o_ref[...] = (shifted - lse).astype(o_ref.dtype)


def prepare_params(params):
    """One-time parameter prep / shape check (call once, outside the hot path).

    Expects PyTorch-equivalent weights laid out as (in_features, out_features)
    and biases as (1, out_features) -- i.e. nn.Linear's weight transposed and
    bias reshaped."""
    p = {k: jnp.asarray(v, jnp.float32) for k, v in params.items()}
    assert p["w1"].shape == (INPUT_SIZE, HIDDEN) and p["b1"].shape == (1, HIDDEN)
    assert p["w2"].shape == (HIDDEN, HIDDEN) and p["b2"].shape == (1, HIDDEN)
    assert p["w3"].shape == (HIDDEN, OUTPUT_SIZE) and p["b3"].shape == (1, OUTPUT_SIZE)
    return p


@jax.jit
def network_forward(x, params):
    """x: (B, 38) float32.  params: output of prepare_params()."""
    B = x.shape[0]
    B8 = _round_up(max(B, 1), 8)

    # Batch tile: large enough to amortize ~0.35us per-grid-step overhead, but
    # split into >= 2 tiles for moderate batches so the "parallel" annotation
    # keeps both TensorCores busy on v7x.
    TB = min(2048, B8)
    if B8 >= 16 and B8 // TB < 2:
        TB = _round_up(pl.cdiv(B8, 2), 8)
    B_pad = _round_up(B8, TB)
    grid = (B_pad // TB,)

    x32 = x.astype(jnp.float32)
    x_pad = x32 if B_pad == B else jnp.pad(x32, ((0, B_pad - B), (0, 0)))

    # Batch-tiled activations; weights/biases VMEM-resident (constant index_map).
    x_spec = pl.BlockSpec((TB, INPUT_SIZE), lambda i: (i, 0))
    o_spec = pl.BlockSpec((TB, OUTPUT_SIZE), lambda i: (i, 0))
    resident = lambda shape: pl.BlockSpec(shape, lambda i: (0, 0))

    out = pl.pallas_call(
        _mlp_kernel,
        out_shape=jax.ShapeDtypeStruct((B_pad, OUTPUT_SIZE), jnp.float32),
        grid=grid,
        in_specs=[
            x_spec,
            resident((INPUT_SIZE, HIDDEN)),
            resident((1, HIDDEN)),
            resident((HIDDEN, HIDDEN)),
            resident((1, HIDDEN)),
            resident((HIDDEN, OUTPUT_SIZE)),
            resident((1, OUTPUT_SIZE)),
        ],
        out_specs=o_spec,
        compiler_params=pltpu.CompilerParams(
            dimension_semantics=("parallel",),
            vmem_limit_bytes=32 << 20,
        ),
    )(x_pad, params["w1"], params["b1"], params["w2"], params["b2"],
      params["w3"], params["b3"])

    return out if B_pad == B else out[:B]


def init_params(key):
    """Deterministic init mimicking PyTorch Linear's U(-1/sqrt(fan_in), +)."""
    ks = jax.random.split(key, 6)

    def linear(kw, kb, fan_in, fan_out):
        bound = 1.0 / jnp.sqrt(fan_in)
        w = jax.random.uniform(kw, (fan_in, fan_out), jnp.float32, -bound, bound)
        b = jax.random.uniform(kb, (1, fan_out), jnp.float32, -bound, bound)
        return w, b

    w1, b1 = linear(ks[0], ks[1], INPUT_SIZE, HIDDEN)
    w2, b2 = linear(ks[2], ks[3], HIDDEN, HIDDEN)
    w3, b3 = linear(ks[4], ks[5], HIDDEN, OUTPUT_SIZE)
    return {"w1": w1, "b1": b1, "w2": w2, "b2": b2, "w3": w3, "b3": b3}


def _reference_forward(x, params):
    """Pure-JAX f32 reference (identical math to the PyTorch eval forward)."""
    h1 = jnp.maximum(x @ params["w1"] + params["b1"], 0.0)
    h2 = jnp.maximum(h1 @ params["w2"] + params["b2"], 0.0)
    logits = h2 @ params["w3"] + params["b3"]
    return jax.nn.log_softmax(logits, axis=1)


if __name__ == "__main__":
    key = jax.random.PRNGKey(0)
    pkey, xkey = jax.random.split(key)

    params = prepare_params(init_params(pkey))
    x = jax.random.normal(xkey, (8, INPUT_SIZE), jnp.float32)  # batch=8

    out = jax.block_until_ready(network_forward(x, params))
    assert out.shape == (8, OUTPUT_SIZE)

    # Sanity 1: log_softmax rows should sum (in prob space) to ~1.
    row_sums = jnp.sum(jnp.exp(out), axis=1)
    assert bool(jnp.all(jnp.abs(row_sums - 1.0) < 1e-4)), "row sums off"

    # Sanity 2: match the pure-JAX f32 reference.
    ref = _reference_forward(x, params)
    assert bool(jnp.max(jnp.abs(out - ref)) < 1e-3), "mismatch vs reference"

    print("KERNEL_OK")
</pallas_src>

<mosaic_0001>
module attributes {stable_mosaic.version = 11 : i64} {
  func.func @_mlp_kernel(%arg0: i32, %arg1: memref<8x38xf32, #tpu.memory_space<vmem>>, %arg2: memref<38x128xf32, #tpu.memory_space<vmem>>, %arg3: memref<1x128xf32, #tpu.memory_space<vmem>>, %arg4: memref<128x128xf32, #tpu.memory_space<vmem>>, %arg5: memref<1x128xf32, #tpu.memory_space<vmem>>, %arg6: memref<128x32xf32, #tpu.memory_space<vmem>>, %arg7: memref<1x32xf32, #tpu.memory_space<vmem>>, %arg8: memref<8x32xf32, #tpu.memory_space<vmem>>) attributes {dimension_semantics = [#tpu.dimension_semantics<parallel>], iteration_bounds = array<i64: 1>, scalar_prefetch = 0 : i64, scratch_operands = 0 : i64, tpu.core_type = #tpu.core_type<tc>, window_params = [{transform_indices = @transform_0, window_bounds = array<i64: 8, 38>}, {pipeline_mode = #tpu.pipeline_mode<synchronous>, transform_indices = @transform_1, window_bounds = array<i64: 38, 128>}, {pipeline_mode = #tpu.pipeline_mode<synchronous>, transform_indices = @transform_2, window_bounds = array<i64: 1, 128>}, {pipeline_mode = #tpu.pipeline_mode<synchronous>, transform_indices = @transform_3, window_bounds = array<i64: 128, 128>}, {pipeline_mode = #tpu.pipeline_mode<synchronous>, transform_indices = @transform_4, window_bounds = array<i64: 1, 128>}, {pipeline_mode = #tpu.pipeline_mode<synchronous>, transform_indices = @transform_5, window_bounds = array<i64: 128, 32>}, {pipeline_mode = #tpu.pipeline_mode<synchronous>, transform_indices = @transform_6, window_bounds = array<i64: 1, 32>}, {transform_indices = @transform_7, window_bounds = array<i64: 8, 32>}]} {
    %c0 = arith.constant 0 : index
    %c0_0 = arith.constant 0 : index
    %0 = vector.load %arg1[%c0, %c0_0] : memref<8x38xf32, #tpu.memory_space<vmem>>, vector<8x38xf32>
    %c0_1 = arith.constant 0 : index
    %c0_2 = arith.constant 0 : index
    %1 = vector.load %arg2[%c0_1, %c0_2] : memref<38x128xf32, #tpu.memory_space<vmem>>, vector<38x128xf32>
    %cst = arith.constant dense<0.000000e+00> : vector<8x128xf32>
    %2 = tpu.matmul %0, %1, %cst {dimension_numbers = #tpu.dot_dimension_numbers<[1], [0], [0], [1], [0, 0, 1, 1], [], []>} : vector<8x38xf32>, vector<38x128xf32>, vector<8x128xf32> -> vector<8x128xf32>
    %c0_3 = arith.constant 0 : index
    %c0_4 = arith.constant 0 : index
    %3 = vector.load %arg3[%c0_3, %c0_4] : memref<1x128xf32, #tpu.memory_space<vmem>>, vector<1x128xf32>
    %4 = vector.broadcast %3 : vector<1x128xf32> to vector<8x128xf32>
    %5 = arith.addf %2, %4 : vector<8x128xf32>
    %cst_5 = arith.constant 0.000000e+00 : f32
    %6 = vector.broadcast %cst_5 : f32 to vector<8x128xf32>
    %7 = arith.maximumf %5, %6 : vector<8x128xf32>
    %c0_6 = arith.constant 0 : index
    %c0_7 = arith.constant 0 : index
    %8 = vector.load %arg4[%c0_6, %c0_7] : memref<128x128xf32, #tpu.memory_space<vmem>>, vector<128x128xf32>
    %cst_8 = arith.constant dense<0.000000e+00> : vector<8x128xf32>
    %9 = tpu.matmul %7, %8, %cst_8 {dimension_numbers = #tpu.dot_dimension_numbers<[1], [0], [0], [1], [0, 0, 1, 1], [], []>} : vector<8x128xf32>, vector<128x128xf32>, vector<8x128xf32> -> vector<8x128xf32>
    %c0_9 = arith.constant 0 : index
    %c0_10 = arith.constant 0 : index
    %10 = vector.load %arg5[%c0_9, %c0_10] : memref<1x128xf32, #tpu.memory_space<vmem>>, vector<1x128xf32>
    %11 = vector.broadcast %10 : vector<1x128xf32> to vector<8x128xf32>
    %12 = arith.addf %9, %11 : vector<8x128xf32>
    %cst_11 = arith.constant 0.000000e+00 : f32
    %13 = vector.broadcast %cst_11 : f32 to vector<8x128xf32>
    %14 = arith.maximumf %12, %13 : vector<8x128xf32>
    %c0_12 = arith.constant 0 : index
    %c0_13 = arith.constant 0 : index
    %15 = vector.load %arg6[%c0_12, %c0_13] : memref<128x32xf32, #tpu.memory_space<vmem>>, vector<128x32xf32>
    %cst_14 = arith.constant dense<0.000000e+00> : vector<8x32xf32>
    %16 = tpu.matmul %14, %15, %cst_14 {dimension_numbers = #tpu.dot_dimension_numbers<[1], [0], [0], [1], [0, 0, 1, 1], [], []>} : vector<8x128xf32>, vector<128x32xf32>, vector<8x32xf32> -> vector<8x32xf32>
    %c0_15 = arith.constant 0 : index
    %c0_16 = arith.constant 0 : index
    %17 = vector.load %arg7[%c0_15, %c0_16] : memref<1x32xf32, #tpu.memory_space<vmem>>, vector<1x32xf32>
    %18 = vector.broadcast %17 : vector<1x32xf32> to vector<8x32xf32>
    %19 = arith.addf %16, %18 : vector<8x32xf32>
    %cst_17 = arith.constant dense<0xFF800000> : vector<8xf32>
    %20 = vector.multi_reduction <maximumf>, %19, %cst_17 [1] : vector<8x32xf32> to vector<8xf32>
    %21 = vector.shape_cast %20 : vector<8xf32> to vector<8x1xf32>
    %22 = vector.broadcast %21 : vector<8x1xf32> to vector<8x32xf32>
    %23 = arith.subf %19, %22 : vector<8x32xf32>
    %24 = math.exp %23 : vector<8x32xf32>
    %cst_18 = arith.constant dense<0.000000e+00> : vector<8xf32>
    %25 = vector.multi_reduction <add>, %24, %cst_18 [1] : vector<8x32xf32> to vector<8xf32>
    %26 = vector.shape_cast %25 : vector<8xf32> to vector<8x1xf32>
    %27 = math.log %26 : vector<8x1xf32>
    %28 = vector.broadcast %27 : vector<8x1xf32> to vector<8x32xf32>
    %29 = arith.subf %23, %28 : vector<8x32xf32>
    %c0_19 = arith.constant 0 : index
    %c0_20 = arith.constant 0 : index
    %30 = vector.load %arg8[%c0_19, %c0_20] : memref<8x32xf32, #tpu.memory_space<vmem>>, vector<8x32xf32>
    tpu.vector_store %arg8[%c0_19, %c0_20], %29 {strides = array<i32>} : memref<8x32xf32, #tpu.memory_space<vmem>>, vector<8x32xf32>,
    return
  }
  func.func @transform_0(%arg0: i32) -> (i32, i32) {
    %c0_i32 = arith.constant 0 : i32
    %c0_i32_0 = arith.constant 0 : i32
    return %arg0, %c0_i32 : i32, i32
  }
  func.func @transform_1(%arg0: i32) -> (i32, i32) {
    %c0_i32 = arith.constant 0 : i32
    %c0_i32_0 = arith.constant 0 : i32
    %c0_i32_1 = arith.constant 0 : i32
    return %c0_i32, %c0_i32_0 : i32, i32
  }
  func.func @transform_2(%arg0: i32) -> (i32, i32) {
    %c0_i32 = arith.constant 0 : i32
    %c0_i32_0 = arith.constant 0 : i32
    %c0_i32_1 = arith.constant 0 : i32
    return %c0_i32, %c0_i32_0 : i32, i32
  }
  func.func @transform_3(%arg0: i32) -> (i32, i32) {
    %c0_i32 = arith.constant 0 : i32
    %c0_i32_0 = arith.constant 0 : i32
    %c0_i32_1 = arith.constant 0 : i32
    return %c0_i32, %c0_i32_0 : i32, i32
  }
  func.func @transform_4(%arg0: i32) -> (i32, i32) {
    %c0_i32 = arith.constant 0 : i32
    %c0_i32_0 = arith.constant 0 : i32
    %c0_i32_1 = arith.constant 0 : i32
    return %c0_i32, %c0_i32_0 : i32, i32
  }
  func.func @transform_5(%arg0: i32) -> (i32, i32) {
    %c0_i32 = arith.constant 0 : i32
    %c0_i32_0 = arith.constant 0 : i32
    %c0_i32_1 = arith.constant 0 : i32
    return %c0_i32, %c0_i32_0 : i32, i32
  }
  func.func @transform_6(%arg0: i32) -> (i32, i32) {
    %c0_i32 = arith.constant 0 : i32
    %c0_i32_0 = arith.constant 0 : i32
    %c0_i32_1 = arith.constant 0 : i32
    return %c0_i32, %c0_i32_0 : i32, i32
  }
  func.func @transform_7(%arg0: i32) -> (i32, i32) {
    %c0_i32 = arith.constant 0 : i32
    %c0_i32_0 = arith.constant 0 : i32
    return %arg0, %c0_i32 : i32, i32
  }
}

</mosaic_0001>

<bundles_post_ra>
// kernel: network_forward.1
= control target key start
LH: loop header
LB: loop body
LE: loop exit
PB: predicated region body
PF: predicated region fallthrough
CT: control target
= control target key end

     0   :  { %12 = vsyncpa [#allocation3], 0  ;;  %s420_s0 = inlined_call_operand.vmem [shape: f32[8,38], index: 0, kind: input, shape index: {}]   ;;  %s421_s1 = inlined_call_operand.hbm [shape: f32[38,128], index: 1, kind: input, shape index: {}]   ;;  %s422_s2 = inlined_call_operand.vmem [shape: f32[1,128], index: 2, kind: input, shape index: {}]   ;;  %s423_s3 = inlined_call_operand.vmem [shape: f32[128,128], index: 3, kind: input, shape index: {}]   ;;  %s424_s4 = inlined_call_operand.vmem [shape: f32[1,128], index: 4, kind: input, shape index: {}]   ;;  %s425_s5 = inlined_call_operand.vmem [shape: f32[128,32], index: 5, kind: input, shape index: {}]   ;;  %s426_s6 = inlined_call_operand.vmem [shape: f32[1,32], index: 6, kind: input, shape index: {}]   ;;  %s427_s7 = inlined_call_operand.hbm [shape: f32[8,32], index: 7, kind: output, shape index: {}]  }
   0x1   :  { %13 = vsyncpa [#allocation4], 0  ;;  %s20_s26 = sshll.u32 %s421_s1, 4  ;;  %s259_s27 = smov [#allocation2]   ;;  %s21_s26 = int_to_ptr.hbm [resolvable:$true] %s20_s26 }
   0x2   :  { %s22_s28 = sshll.u32 %s259_s27, 4  ;;  %s260_s29 = smov 128   ;;  %s23_s28 = int_to_ptr.vmem [resolvable:$true] %s22_s28 }
   0x3   :  { %s261_s30 = smov 8  }
   0x4   :  { %28 = dma.hbm_to_vmem [thread:$0]  %s21_s26, 640, %s23_s28, [#allocation3], %s260_s29, %s260_s29, %s261_s30  }
   0x5   :  { %255 = dma.done.wait [#allocation3], 640  }
   0x6   :  { %256 = vsyncadd [#allocation3], 4294966656  ;;  %vm57_vm0 = vcmask 1045504   ;;  %v48_v0 = vld [vmem:[#allocation2 + $0x20] sm:$0x3f]  ;;  %v47_v1 = vld [vmem:[#allocation2 + $0x18] sm:$0xff] }
   0x7   :  { %194 = vmatpush.msk.msra.mxu0 %vm57_vm0, %v48_v0  ;;  %v46_v2 = vld [vmem:[#allocation2 + $0x10] sm:$0xff]  ;;  %v97_v3 = vld [vmem:[%s423_s3 + $0x78] sm:$0xff]  ;;  %v45_v5 = vld [vmem:[#allocation2 + $0x8] sm:$0xff]  ;;  %vm53_vm1 = vcmask 310272   ;;  %vm163_vm2 = vcmask 261120   ;;  %s184_s26 = sshll.u32 %s427_s7, 4  ;;  %s185_s26 = int_to_ptr.hbm [resolvable:$true] %s184_s26 }
   0x8   :  { %v96_v4 = vld [vmem:[%s423_s3 + $0x70] sm:$0xff]  ;;  %102 = vmatpush.msra.mxu1 %v97_v3  ;;  %v95_v6 = vld [vmem:[%s423_s3 + $0x68] sm:$0xff]  ;;  %v44_v7 = vld [vmem:[#allocation2] sm:$0xff] }
   0x9   :  { %73 = vmatpush.msra.mxu0 %v47_v1  ;;  %v94_v8 = vld [vmem:[%s423_s3 + $0x60] sm:$0xff]  ;;  %v93_v10 = vld [vmem:[%s423_s3 + $0x58] sm:$0xff]  ;;  %v92_v11 = vld [vmem:[%s423_s3 + $0x50] sm:$0xff] }
   0xa   :  { %103 = vmatpush.msra.mxu1 %v96_v4  ;;  %v43_v9 = vld [vmem:[%s420_s0] sm:$0xff]  ;;  %v91_v12 = vld [vmem:[%s423_s3 + $0x48] sm:$0xff]  ;;  %v89_v14 = vld [vmem:[%s423_s3 + $0x38] sm:$0xff] }
   0xb   :  { %74 = vmatpush.msra.mxu0 %v46_v2  ;;  %v90_v13 = vld [vmem:[%s423_s3 + $0x40] sm:$0xff]  ;;  %v88_v15 = vld [vmem:[%s423_s3 + $0x30] sm:$0xff]  ;;  %v87_v16 = vld [vmem:[%s423_s3 + $0x28] sm:$0xff] }
   0xc   :  { %104 = vmatpush.msra.mxu1 %v95_v6  ;;  %v86_v17 = vld [vmem:[%s423_s3 + $0x20] sm:$0xff]  ;;  %v85_v18 = vld [vmem:[%s423_s3 + $0x18] sm:$0xff]  ;;  %v84_v19 = vld [vmem:[%s423_s3 + $0x10] sm:$0xff] }
   0xd   :  { %75 = vmatpush.msra.mxu0 %v45_v5  ;;  %v83_v20 = vld [vmem:[%s423_s3 + $0x8] sm:$0xff]  ;;  %v82_v21 = vld [vmem:[%s423_s3] sm:$0xff]  ;;  %v138_v22 = vld [vmem:[%s425_s5 + $0x78] sm:$0xff] }
   0xe   :  { %105 = vmatpush.msra.mxu1 %v94_v8  ;;  %v137_v23 = vld [vmem:[%s425_s5 + $0x70] sm:$0xff]  ;;  %143 = vmatpush.msra.mxu2 %v138_v22  ;;  %v136_v24 = vld [vmem:[%s425_s5 + $0x68] sm:$0xff]  ;;  %v135_v25 = vld [vmem:[%s425_s5 + $0x60] sm:$0xff] }
   0xf   :  { %76 = vmatpush.msra.mxu0 %v44_v7  ;;  %v134_v26 = vld [vmem:[%s425_s5 + $0x58] sm:$0xff]  ;;  %v133_v27 = vld [vmem:[%s425_s5 + $0x50] sm:$0xff]  ;;  %v132_v28 = vld [vmem:[%s425_s5 + $0x48] sm:$0xff] }
  0x10   :  { %195 = vmatmul.msk.f32.vlgmr.msra.gmra.mxu0 %vm53_vm1, %v43_v9  ;;  %106 = vmatpush.msra.mxu1 %v93_v10  ;;  %v131_v29 = vld [vmem:[%s425_s5 + $0x40] sm:$0xff]  ;;  %v130_v30 = vld [vmem:[%s425_s5 + $0x38] sm:$0xff]  ;;  %v129_v31 = vld [vmem:[%s425_s5 + $0x30] sm:$0xff] }
  0x11   :  { %144 = vmatpush.msra.mxu2 %v137_v23  ;;  %v128_v32 = vld [vmem:[%s425_s5 + $0x28] sm:$0xff]  ;;  %v127_v33 = vld [vmem:[%s425_s5 + $0x20] sm:$0xff]  ;;  %v126_v34 = vld [vmem:[%s425_s5 + $0x18] sm:$0xff] }
  0x12   :  { %107 = vmatpush.msra.mxu1 %v92_v11  ;;  %v200_v35 = vld [vmem:[%s422_s2] ss:$0 sm:$0xff]  ;;  %v125_v39 = vld [vmem:[%s425_s5 + $0x10] sm:$0xff]  ;;  %v124_v40 = vld [vmem:[%s425_s5 + $0x8] sm:$0xff] }
  0x13   :  { %145 = vmatpush.msra.mxu2 %v136_v24  ;;  %v123_v41 = vld [vmem:[%s425_s5] sm:$0xff] }
  0x14   :  { %108 = vmatpush.msra.mxu1 %v91_v12  ;;  %v201_v42 = vld [vmem:[%s424_s4] ss:$0 sm:$0xff]  ;;  %s262_s4 = smov [#allocation5]  }
  0x15   :  { %146 = vmatpush.msra.mxu2 %v135_v25  ;;  %v202_v46 = vld [vmem:[%s426_s6] ss:$0 sm:$0xff]  ;;  %s182_s5 = sshll.u32 %s262_s4, 4  ;;  %s183_s5 = int_to_ptr.vmem [resolvable:$true] %s182_s5 }
  0x16   :  { %109 = vmatpush.msra.mxu1 %v90_v13 }
  0x17   :  { %147 = vmatpush.msra.mxu2 %v134_v26 }
  0x18   :  { %110 = vmatpush.msra.mxu1 %v89_v14 }
  0x19   :  { %148 = vmatpush.msra.mxu2 %v133_v27 }
  0x1a   :  { %111 = vmatpush.msra.mxu1 %v88_v15 }
  0x1b   :  { %149 = vmatpush.msra.mxu2 %v132_v28 }
  0x1c   :  { %112 = vmatpush.msra.mxu1 %v87_v16 }
  0x1d   :  { %150 = vmatpush.msra.mxu2 %v131_v29 }
  0x1e   :  { %113 = vmatpush.msra.mxu1 %v86_v17 }
  0x1f   :  { %151 = vmatpush.msra.mxu2 %v130_v30 }
  0x20   :  { %114 = vmatpush.msra.mxu1 %v85_v18 }
  0x21   :  { %152 = vmatpush.msra.mxu2 %v129_v31 }
  0x22   :  { %115 = vmatpush.msra.mxu1 %v84_v19 }
  0x23   :  { %153 = vmatpush.msra.mxu2 %v128_v32 }
  0x24   :  { %116 = vmatpush.msra.mxu1 %v83_v20 }
  0x25   :  { %154 = vmatpush.msra.mxu2 %v127_v33 }
  0x26   :  { %117 = vmatpush.msra.mxu1 %v82_v21 }
  0x27   :  { %155 = vmatpush.msra.mxu2 %v126_v34 }
  0x29   :  { %156 = vmatpush.msra.mxu2 %v125_v39 }
  0x2b   :  { %157 = vmatpush.msra.mxu2 %v124_v40 }
  0x2d   :  { %158 = vmatpush.msra.mxu2 %v123_v41 }
  0x8d   :  { %v78_v36 = vpop.f32.mrf.mxu0 }
  0x8e   :  { %v79_v37 = vadd.f32 %v200_v35, %v78_v36 }
  0x90   :  { %v81_v38 = vmax.f32 %v79_v37, 0.0 }
  0x92   :  { %118 = vmatmul.f32.vlgmr.msra.gmra.mxu1 %v81_v38 }
 0x10f   :  { %v119_v43 = vpop.f32.mrf.mxu1 }
 0x110   :  { %v120_v44 = vadd.f32 %v201_v42, %v119_v43 }
 0x112   :  { %v122_v45 = vmax.f32 %v120_v44, 0.0 }
 0x114   :  { %159 = vmatmul.f32.vlgmr.msra.gmra.mxu2 %v122_v45 }
 0x197   :  { %v160_v47 = vpop.f32.mrf.mxu2 }
 0x198   :  { %v161_v48 = vadd.f32 %v202_v46, %v160_v47 }
 0x19a   :  { %v164_v49 = vsel %vm163_vm2, %v161_v48, -inf }
 0x19b   :  { %165 = vmax.xlane.f32.xlu0 %v164_v49 }
 0x20e   :  { %v166_v50 = vpop.xlane.xlu0 %165 }
 0x20f   :  { %v167_v51 = vsub.f32 %v161_v48, %v166_v50 }
 0x211   :  { %v168_v52 = vmul.f32 1.442695, %v167_v51 }
 0x213   :  { %203 = vpow2.f32 %v168_v52 }
 0x219   :  { %v204_v53 = vpop.eup %203 }
 0x21a   :  { %v170_v54 = vsel %vm163_vm2, %v204_v53, 0.0 }
 0x21b   :  { %171 = vadd.xlane.f32.xlu0 %v170_v54 }
 0x28e   :  { %v172_v55 = vpop.xlane.xlu0 %171 }
 0x28f   :  { %205 = vlog2.f32 %v172_v55 }
 0x295   :  { %v206_v56 = vpop.eup %205 }
 0x296   :  { %v174_v57 = vmul.f32 0.6931472, %v206_v56 }
 0x298   :  { %v175_v58 = vsub.f32 %v167_v51, %v174_v57 }
 0x29a   :  { %176 = vst.msk [vmem:[#allocation5] sm:$0xff] %vm163_vm2, %v175_v58 }
 0x29b   :  { %187 = dma.vmem_to_hbm [thread:$0]  %s183_s5, 128, %s185_s26, [#allocation4]  }
 0x29c   :  { %257 = dma.done.wait [#allocation4], 128  }
 0x29d   :  { %258 = vsyncadd [#allocation4], 4294967168 }
 0x29e   :  { %192 = vsyncpa [#allocation3], 1 }
 0x29f   :  { %193 = vsyncpa [#allocation4], 1 }

</bundles_post_ra>
